<compile_context>
chip_gen: v7x
topology: tpu7x:2x2x1
jax: 0.10.0
libtpu: 0.0.40
codegen_flags: <defaults>
</compile_context>

<pallas_src>
import jax
import jax.numpy as jnp
from jax.experimental import pallas as pl
from jax.experimental.pallas import tpu as pltpu


# ---------------------------------------------------------------------------
# Kernels
# ---------------------------------------------------------------------------

def _lm_head_kernel_single_k(x_ref, w_ref, o_ref):
    # x_ref: (tile_m, H)       compute dtype (bf16)
    # w_ref: (H, tile_v)       compute dtype (bf16), already [H, V] orientation
    # o_ref: (tile_m, tile_v)  out dtype
    o_ref[...] = jnp.dot(
        x_ref[...], w_ref[...], preferred_element_type=jnp.float32
    ).astype(o_ref.dtype)


def _lm_head_kernel_acc(x_ref, w_ref, o_ref, acc_ref):
    # K-tiled variant: grid = (m, v, k) with k last ("arbitrary").
    # x_ref: (tile_m, tile_k); w_ref: (tile_k, tile_v)
    # acc_ref: (tile_m, tile_v) f32 accumulator, resident across the k loop.
    k = pl.program_id(2)

    @pl.when(k == 0)
    def _():
        acc_ref[...] = jnp.zeros_like(acc_ref)

    acc_ref[...] += jnp.dot(
        x_ref[...], w_ref[...], preferred_element_type=jnp.float32
    )

    @pl.when(k == pl.num_programs(2) - 1)
    def _():
        o_ref[...] = acc_ref[...].astype(o_ref.dtype)


# ---------------------------------------------------------------------------
# Helpers
# ---------------------------------------------------------------------------

def _round_up(x, m):
    return ((x + m - 1) // m) * m


def _largest_divisor_multiple(n, base, cap):
    """Largest d with d % base == 0, d | n, d <= cap.  Returns 0 if none."""
    best = 0
    d = base
    limit = min(n, cap)
    while d <= limit:
        if n % d == 0:
            best = d
        d += base
    return best


def _vmem_capacity_bytes():
    try:
        return int(pltpu.get_tpu_info().vmem_capacity_bytes)
    except Exception:
        return 64 << 20  # conservative (v7x per-TensorCore VMEM)


# ---------------------------------------------------------------------------
# One-time weight preparation (model-load time) -- hoisted out of the per-call
# path per the performance review.
# ---------------------------------------------------------------------------

def prepare_lm_head_weight(weight, *, compute_dtype=jnp.bfloat16):
    """weight: [V, H] -> (w_prepped [H, V_pad], V).

    Transpose to MXU-native RHS orientation, cast to the compute dtype, and
    (only if V is not a multiple of 128 -- rare) zero-pad the vocab dimension.
    Do this once and reuse the result for every forward call.
    """
    V, H = weight.shape
    w_t = jnp.asarray(weight, compute_dtype).T  # [H, V]
    V_pad = _round_up(V, 128)
    if V_pad != V:
        w_t = jnp.pad(w_t, ((0, 0), (0, V_pad - V)))
    return w_t, V


# ---------------------------------------------------------------------------
# Forward
# ---------------------------------------------------------------------------

def lm_head_forward(
    hidden_states,
    w_prepped,
    vocab_size,
    *,
    out_dtype=jnp.float32,   # bf16 halves logits writeback for prefill if ok
    tile_m=None,
    tile_v=None,
    tile_k=None,
):
    """hidden_states: [B, S, H]; w_prepped: [H, V_pad] -> logits [B, S, V]."""
    B, S, H = hidden_states.shape
    H_w, V_pad = w_prepped.shape
    assert H_w == H, "hidden size mismatch"
    V = int(vocab_size)
    compute_dtype = w_prepped.dtype

    M = B * S
    x2d = hidden_states.reshape(M, H)
    if x2d.dtype != compute_dtype:
        x2d = x2d.astype(compute_dtype)

    vmem_cap = _vmem_capacity_bytes()
    budget = max(vmem_cap - (12 << 20), 16 << 20)  # headroom for Mosaic scratch

    in_item = jnp.dtype(compute_dtype).itemsize
    out_item = jnp.dtype(out_dtype).itemsize

    # --- K (hidden) tiling: keep full H resident when small enough, otherwise
    # add an "arbitrary" reduction axis (f32 accumulator in VMEM).
    if tile_k is None:
        tile_k_cap = 4096
        if H <= tile_k_cap:
            tile_k = H
        else:
            tile_k = _largest_divisor_multiple(H, 128, tile_k_cap) or H
    grid_k = H // tile_k if H % tile_k == 0 else 1

    # --- Vocab tiling: exact multiple-of-128 divisor of V_pad (no per-call
    # padding / output slicing needed when V itself is a multiple of 128).
    if tile_v is None:
        tile_v_cap = 2048 if vmem_cap >= (96 << 20) else 1024
        tile_v = _largest_divisor_multiple(V_pad, 128, tile_v_cap) or V_pad
    grid_v = V_pad // tile_v

    # --- M tiling: as large as the budget allows (the weight is re-streamed
    # grid_m times, so a bigger tile_m directly cuts HBM traffic in prefill).
    if tile_m is None:
        tile_m = min(1024, _round_up(M, 8))

    def _est():
        acc = tile_m * tile_v * 4 if grid_k > 1 else 0
        return (
            2 * tile_m * tile_k * in_item      # double-buffered activations
            + 2 * tile_k * tile_v * in_item    # double-buffered weight tiles
            + 2 * tile_m * tile_v * out_item   # double-buffered output tiles
            + acc                              # f32 accumulator (K-tiled path)
        )

    # Shrink tiles to fit the generation-specific VMEM budget (m first, then v).
    while _est() > budget and tile_m > 128:
        tile_m = _round_up(max(tile_m // 2, 8), 8)
    while _est() > budget and tile_v > 128:
        smaller = _largest_divisor_multiple(V_pad, 128, tile_v // 2)
        if smaller == 0 or smaller == tile_v:
            break
        tile_v = smaller
        grid_v = V_pad // tile_v

    M_pad = _round_up(M, tile_m)
    if M_pad != M:
        x2d = jnp.pad(x2d, ((0, M_pad - M), (0, 0)))
    grid_m = M_pad // tile_m

    vmem_limit = int(
        max(min(_est() + (4 << 20), vmem_cap - (2 << 20)), 16 << 20)
    )

    if grid_k == 1:
        kernel = _lm_head_kernel_single_k
        grid = (grid_m, grid_v)
        in_specs = [
            pl.BlockSpec((tile_m, tile_k), lambda m, v: (m, 0)),
            pl.BlockSpec((tile_k, tile_v), lambda m, v: (0, v)),
        ]
        out_specs = pl.BlockSpec((tile_m, tile_v), lambda m, v: (m, v))
        scratch_shapes = ()
        semantics = ("parallel", "parallel")
    else:
        kernel = _lm_head_kernel_acc
        grid = (grid_m, grid_v, grid_k)
        in_specs = [
            pl.BlockSpec((tile_m, tile_k), lambda m, v, k: (m, k)),
            pl.BlockSpec((tile_k, tile_v), lambda m, v, k: (k, v)),
        ]
        out_specs = pl.BlockSpec((tile_m, tile_v), lambda m, v, k: (m, v))
        scratch_shapes = (pltpu.VMEM((tile_m, tile_v), jnp.float32),)
        semantics = ("parallel", "parallel", "arbitrary")

    out = pl.pallas_call(
        kernel,
        out_shape=jax.ShapeDtypeStruct((M_pad, V_pad), out_dtype),
        grid_spec=pltpu.PrefetchScalarGridSpec(
            num_scalar_prefetch=0,
            grid=grid,
            in_specs=in_specs,
            out_specs=out_specs,
            scratch_shapes=scratch_shapes,
        ),
        compiler_params=pltpu.CompilerParams(
            dimension_semantics=semantics,
            vmem_limit_bytes=vmem_limit,
        ),
    )(x2d, w_prepped)

    # Slice only when padding was actually required (rare: V % 128 != 0 or
    # M not a multiple of tile_m).
    if M_pad != M or V_pad != V:
        out = out[:M, :V]
    return out.reshape(B, S, V)


# ---------------------------------------------------------------------------
# Demo / correctness check
# ---------------------------------------------------------------------------

if __name__ == "__main__":
    # Small shapes consistent with the module: batch=2, seq=8, hidden=32, vocab=256
    B, S, H, V = 2, 8, 32, 256

    key = jax.random.PRNGKey(0)
    k_x, k_w = jax.random.split(key)
    hidden_states = jax.random.normal(k_x, (B, S, H), dtype=jnp.float32)
    # Module's weight shape: [vocab, hidden]
    weight = jax.random.normal(k_w, (V, H), dtype=jnp.float32) * 0.02

    # One-time weight prep (model-load time), hoisted out of the per-call path.
    w_prepped, vocab = prepare_lm_head_weight(weight)
    w_prepped = jax.block_until_ready(w_prepped)

    logits = lm_head_forward(hidden_states, w_prepped, vocab)
    logits = jax.block_until_ready(logits)
    assert logits.shape == (B, S, V)

    # Reference 1: same bf16-operand / f32-accumulate recipe (tight tolerance).
    x_bf = hidden_states.reshape(B * S, H).astype(jnp.bfloat16)
    w_bf = weight.astype(jnp.bfloat16)
    ref_bf = jnp.dot(x_bf, w_bf.T, preferred_element_type=jnp.float32).reshape(B, S, V)
    assert jnp.allclose(logits, ref_bf, atol=1e-3, rtol=1e-3)

    # Reference 2: full-f32 F.linear semantics (loose tolerance, bf16 rounding).
    ref_f32 = hidden_states @ weight.T
    assert jnp.allclose(logits, ref_f32, atol=2e-2, rtol=2e-2)

    print("KERNEL_OK")
</pallas_src>

<mosaic_0001>
module attributes {stable_mosaic.version = 11 : i64} {
  func.func @_lm_head_kernel_single_k(%arg0: i32, %arg1: i32, %arg2: memref<16x32xbf16, #tpu.memory_space<vmem>>, %arg3: memref<32x256xbf16, #tpu.memory_space<vmem>>, %arg4: memref<16x256xf32, #tpu.memory_space<vmem>>) attributes {dimension_semantics = [#tpu.dimension_semantics<parallel>, #tpu.dimension_semantics<parallel>], iteration_bounds = array<i64: 1, 1>, scalar_prefetch = 0 : i64, scratch_operands = 0 : i64, tpu.core_type = #tpu.core_type<tc>, window_params = [{transform_indices = @transform_0, window_bounds = array<i64: 16, 32>}, {transform_indices = @transform_1, window_bounds = array<i64: 32, 256>}, {transform_indices = @transform_2, window_bounds = array<i64: 16, 256>}]} {
    %c0 = arith.constant 0 : index
    %c0_0 = arith.constant 0 : index
    %0 = vector.load %arg2[%c0, %c0_0] : memref<16x32xbf16, #tpu.memory_space<vmem>>, vector<16x32xbf16>
    %c0_1 = arith.constant 0 : index
    %c0_2 = arith.constant 0 : index
    %1 = vector.load %arg3[%c0_1, %c0_2] : memref<32x256xbf16, #tpu.memory_space<vmem>>, vector<32x256xbf16>
    %cst = arith.constant dense<0.000000e+00> : vector<16x256xf32>
    %2 = tpu.matmul %0, %1, %cst {dimension_numbers = #tpu.dot_dimension_numbers<[1], [0], [0], [1], [0, 0, 1, 1], [], []>} : vector<16x32xbf16>, vector<32x256xbf16>, vector<16x256xf32> -> vector<16x256xf32>
    %c0_3 = arith.constant 0 : index
    %c0_4 = arith.constant 0 : index
    %3 = vector.load %arg4[%c0_3, %c0_4] : memref<16x256xf32, #tpu.memory_space<vmem>>, vector<16x256xf32>
    tpu.vector_store %arg4[%c0_3, %c0_4], %2 {strides = array<i32>} : memref<16x256xf32, #tpu.memory_space<vmem>>, vector<16x256xf32>,
    return
  }
  func.func @transform_0(%arg0: i32, %arg1: i32) -> (i32, i32) {
    %c0_i32 = arith.constant 0 : i32
    %c0_i32_0 = arith.constant 0 : i32
    return %arg0, %c0_i32 : i32, i32
  }
  func.func @transform_1(%arg0: i32, %arg1: i32) -> (i32, i32) {
    %c0_i32 = arith.constant 0 : i32
    %c0_i32_0 = arith.constant 0 : i32
    return %c0_i32, %arg1 : i32, i32
  }
  func.func @transform_2(%arg0: i32, %arg1: i32) -> (i32, i32) {
    %c0_i32 = arith.constant 0 : i32
    return %arg0, %arg1 : i32, i32
  }
}

</mosaic_0001>

<bundles_post_ra>
// kernel: tpu_custom_call.1
= control target key start
LH: loop header
LB: loop body
LE: loop exit
PB: predicated region body
PF: predicated region fallthrough
CT: control target
= control target key end

     0   :  { %7 = vsyncpa [#allocation3], 0  ;;  %s297_s0 = inlined_call_operand.hbm [shape: bf16[16,32], index: 0, kind: input, shape index: {}]   ;;  %s298_s1 = inlined_call_operand.hbm [shape: bf16[32,256], index: 1, kind: input, shape index: {}]   ;;  %s299_s2 = inlined_call_operand.hbm [shape: f32[16,256], index: 2, kind: output, shape index: {}]  }
   0x1   :  { %8 = vsyncpa [#allocation6], 0 }
   0x2   :  { %9 = vsyncpa [#allocation4], 0  ;;  %s236_s9 = smov [#allocation2]   ;;  %s164_s13 = scalar_lea.hbm %s297_s0, 128 }
   0x3   :  { %s15_s10 = sshll.u32 %s236_s9, 4  ;;  %p165_p0 = scmp.ne.s32.totalorder %s297_s0, %s164_s13  ;;  %s16_s10 = int_to_ptr.vmem [resolvable:$true] %s15_s10 }
   0x4   :  { %p168_p1 = scmp.lt.u32.totalorder %s164_s13, %s297_s0 }
   0x6   :  { %p170_p2 = pnand %p168_p1, %p165_p0 }
   0x8   :  { %173 = shalt.err (!%p170_p2)
}
   0x9   :  { %s174_s18 = scalar_lea.vmem %s16_s10, 128  ;;  %p179_p4 = scmp.lt.s32.totalorder %s16_s10, %s16_s10 }
   0xa   :  { %p175_p3 = scmp.ne.s32.totalorder %s16_s10, %s174_s18  ;;  %p180_p5 = scmp.lt.s32.totalorder %s174_s18, %s174_s18 }
   0xc   :  { %p181_p6 = por %p180_p5, %p179_p4 }
   0xe   :  { %p182_p7 = pnand %p181_p6, %p175_p3 }
  0x10   :  { %185 = shalt.err (!%p182_p7)
}
  0x11   :  { %s237_s19 = smov 64   ;;  %s238_s20 = smov 4  }
  0x12   :  { %21 = dma.hbm_to_vmem [thread:$0]  %s297_s0, 128, %s16_s10, [#allocation3], %s237_s19, %s237_s19, %s238_s20  }
  0x13   :  { %s239_s23 = smov [#allocation5]   ;;  %s186_s27 = scalar_lea.hbm %s298_s1, 512 }
  0x14   :  { %s27_s24 = sshll.u32 %s239_s23, 4  ;;  %p187_p8 = scmp.ne.s32.totalorder %s298_s1, %s186_s27  ;;  %s28_s24 = int_to_ptr.vmem [resolvable:$true] %s27_s24 }
  0x15   :  { %p190_p9 = scmp.lt.u32.totalorder %s186_s27, %s298_s1 }
  0x17   :  { %p192_p10 = pnand %p190_p9, %p187_p8 }
  0x19   :  { %195 = shalt.err (!%p192_p10)
}
  0x1a   :  { %s196_s4 = scalar_lea.vmem %s28_s24, 512  ;;  %p201_p12 = scmp.lt.s32.totalorder %s28_s24, %s28_s24 }
  0x1b   :  { %p197_p11 = scmp.ne.s32.totalorder %s28_s24, %s196_s4  ;;  %p202_p13 = scmp.lt.s32.totalorder %s196_s4, %s196_s4 }
  0x1d   :  { %p203_p0 = por %p202_p13, %p201_p12 }
  0x1f   :  { %p204_p1 = pnand %p203_p0, %p197_p11 }
  0x21   :  { %207 = shalt.err (!%p204_p1)
}
  0x22   :  { %s240_s0 = smov 128   ;;  %s241_s5 = smov 8  }
  0x23   :  { %33 = dma.hbm_to_vmem [thread:$0]  %s298_s1, 512, %s28_s24, [#allocation6], %s240_s0, %s240_s0, %s241_s5  }
  0x24   :  { %230 = dma.done.wait [#allocation3], 128  }
  0x25   :  { %231 = vsyncadd [#allocation3], 4294967168 }
  0x26   :  { %232 = dma.done.wait [#allocation6], 512  }
  0x27   :  { %233 = vsyncadd [#allocation6], 4294966784  ;;  %v242_v0 = vmov 0   ;;  %v157_v1 = vld [vmem:[#allocation5 + $0x4] ss:$8 sps:$4 sm:$0xff]   ;;  %v163_v5 = vld [vmem:[#allocation2] sm:$0xff]  }
  0x28   :  { %108 = vmatprep.mubr.bf16.mxu0 %v242_v0  ;;  %v159_v2 = vld [vmem:[#allocation5] ss:$8 sps:$4 sm:$0xff]   ;;  %76 = vmatprep.subr.bf16.mxu0 %v157_v1  ;;  %v160_v3 = vld [vmem:[#allocation5 + $0x14] ss:$8 sps:$4 sm:$0xff]   ;;  %v162_v4 = vld [vmem:[#allocation5 + $0x10] ss:$8 sps:$4 sm:$0xff]  }
  0x29   :  { %77 = vmatpush1.bf16.msra.mxu0 %v159_v2  ;;  %vm72_vm0 = vcmask 261120   ;;  %s243_s8 = smov [#allocation7]  }
  0x2a   :  { %78 = vmatprep.subr.bf16.mxu0 %v160_v3  ;;  %s128_s9 = sshll.u32 %s243_s8, 4  ;;  %s129_s9 = int_to_ptr.vmem [resolvable:$true] %s128_s9 }
  0x2b   :  { %s208_s1 = scalar_lea.vmem %s129_s9, 512  ;;  %p213_p3 = scmp.lt.s32.totalorder %s129_s9, %s129_s9 }
  0x2c   :  { %p209_p2 = scmp.ne.s32.totalorder %s129_s9, %s208_s1  ;;  %p214_p4 = scmp.lt.s32.totalorder %s208_s1, %s208_s1 }
  0x2d   :  { %79 = vmatpush1.bf16.msra.mxu0 %v162_v4 }
  0x2e   :  { %p215_p5 = por %p214_p4, %p213_p3 }
  0x30   :  { %146 = vmatmul.mubr.msk.bf16.vlgmr.msra.gmra.mrb[0].mxu0 %vm72_vm0, %v163_v5  ;;  %p216_p6 = pnand %p215_p5, %p209_p2 }
 0x103   :  { %v110_v6 = vpop.f32.mrb[0].mxu0 }
 0x104   :  { %119 = vst [vmem:[#allocation7] sm:$0xff] %v110_v6  ;;  %v112_v7 = vpop.f32.mrb[1].mxu0 }
 0x105   :  { %120 = vst [vmem:[#allocation7 + $0x8] sm:$0xff] %v112_v7  ;;  %v114_v8 = vpop.f32.mrb[2].mxu0 }
 0x106   :  { %121 = vst [vmem:[#allocation7 + $0x10] sm:$0xff] %v114_v8  ;;  %v116_v9 = vpop.f32.mrb[3].mxu0 }
 0x107   :  { %122 = vst [vmem:[#allocation7 + $0x18] sm:$0xff] %v116_v9 }
 0x108   :  { %219 = shalt.err (!%p216_p6)
}
 0x109   :  { %s220_s12 = scalar_lea.hbm %s299_s2, 512 }
 0x10a   :  { %p221_p7 = scmp.ne.s32.totalorder %s299_s2, %s220_s12  ;;  %p224_p8 = scmp.lt.u32.totalorder %s220_s12, %s299_s2 }
 0x10c   :  { %p226_p9 = pnand %p224_p8, %p221_p7 }
 0x10e   :  { %229 = shalt.err (!%p226_p9)
}
 0x10f   :  { %s244_s17 = smov 256   ;;  %s245_s18 = smov 16  }
 0x110   :  { %134 = dma.vmem_to_hbm [thread:$0]  %s129_s9, 512, %s299_s2, [#allocation4], %s244_s17, %s244_s17, %s245_s18  }
 0x111   :  { %234 = dma.done.wait [#allocation4], 512  }
 0x112   :  { %235 = vsyncadd [#allocation4], 4294966784 }
 0x113   :  { %138 = vsyncpa [#allocation3], 1 }
 0x114   :  { %139 = vsyncpa [#allocation6], 1 }
 0x115   :  { %140 = vsyncpa [#allocation4], 1 }

</bundles_post_ra>
